<compile_context>
chip_gen: v7x
topology: tpu7x:2x2x1
jax: 0.10.0
libtpu: 0.0.40
codegen_flags: <defaults>
</compile_context>

<pallas_src>
import jax
import jax.numpy as jnp
from jax.experimental import pallas as pl
from jax.experimental.pallas import tpu as pltpu


def identity_kernel(x_ref, o_ref):
    # Pure pass-through on the current VMEM tile.
    o_ref[...] = x_ref[...]


def _sublane_multiple(dtype) -> int:
    # Packed sublane granularity: f32 -> 8, bf16/f16 -> 16, int8/fp8 -> 32.
    itemsize = jnp.dtype(dtype).itemsize
    return {4: 8, 2: 16, 1: 32}.get(itemsize, 8)


def wic_baseline_forward(x, *, max_tile_bytes: int = 4 << 20):
    """Identity forward of WiC_model_baseline as a Pallas pass-through kernel."""
    orig_shape = x.shape
    if x.ndim == 0:
        # Scalar identity; nothing to tile.
        return x
    # Flatten to 2D [M, N] (row-major) so the last dim maps to lanes.
    x2 = x if x.ndim == 2 else x.reshape(-1, orig_shape[-1])
    M, N = x2.shape

    itemsize = jnp.dtype(x2.dtype).itemsize
    sub = _sublane_multiple(x2.dtype)

    # Full-width rows (tn == N, lane-dense); pick tm so the tile is ~max_tile_bytes,
    # rounded down to the packed-sublane multiple.
    rows_budget = max(sub, (max_tile_bytes // max(1, N * itemsize)) // sub * sub)
    tm = M if M <= rows_budget else rows_budget
    grid = (pl.cdiv(M, tm),)

    y2 = pl.pallas_call(
        identity_kernel,
        out_shape=jax.ShapeDtypeStruct((M, N), x2.dtype),
        grid=grid,
        in_specs=[pl.BlockSpec((tm, N), lambda i: (i, 0))],
        out_specs=pl.BlockSpec((tm, N), lambda i: (i, 0)),
        # Output aliases the input buffer: no extra HBM allocation for the result.
        input_output_aliases={0: 0},
        compiler_params=pltpu.CompilerParams(
            dimension_semantics=("parallel",),
            # Raise the scoped-VMEM limit (v5e default is 16 MiB); 4 MiB tiles
            # double-buffered on both sides use <= 16 MiB, well within 32 MiB.
            vmem_limit_bytes=32 << 20,
        ),
    )(x2)

    return y2 if x.ndim == 2 else y2.reshape(orig_shape)


if __name__ == "__main__":
    key = jax.random.PRNGKey(0)
    # Small deterministic input; last two dims aligned to (8, 128) vreg tiling.
    x = jax.random.normal(key, (16, 256), dtype=jnp.float32)

    y = wic_baseline_forward(x)
    jax.block_until_ready(y)

    assert y.shape == x.shape and y.dtype == x.dtype
    assert bool(jnp.allclose(y, x)), "identity kernel mismatch"
    print("KERNEL_OK")
</pallas_src>

<mosaic_0001>
module attributes {stable_mosaic.version = 11 : i64} {
  func.func @identity_kernel(%arg0: i32, %arg1: memref<16x256xf32, #tpu.memory_space<vmem>>, %arg2: memref<16x256xf32, #tpu.memory_space<vmem>>) attributes {dimension_semantics = [#tpu.dimension_semantics<parallel>], iteration_bounds = array<i64: 1>, scalar_prefetch = 0 : i64, scratch_operands = 0 : i64, tpu.core_type = #tpu.core_type<tc>, window_params = [{transform_indices = @transform_0, window_bounds = array<i64: 16, 256>}, {transform_indices = @transform_1, window_bounds = array<i64: 16, 256>}]} {
    %c0 = arith.constant 0 : index
    %c0_0 = arith.constant 0 : index
    %0 = vector.load %arg1[%c0, %c0_0] : memref<16x256xf32, #tpu.memory_space<vmem>>, vector<16x256xf32>
    %c0_1 = arith.constant 0 : index
    %c0_2 = arith.constant 0 : index
    %1 = vector.load %arg2[%c0_1, %c0_2] : memref<16x256xf32, #tpu.memory_space<vmem>>, vector<16x256xf32>
    tpu.vector_store %arg2[%c0_1, %c0_2], %0 {strides = array<i32>} : memref<16x256xf32, #tpu.memory_space<vmem>>, vector<16x256xf32>,
    return
  }
  func.func @transform_0(%arg0: i32) -> (i32, i32) {
    %c0_i32 = arith.constant 0 : i32
    %c0_i32_0 = arith.constant 0 : i32
    return %arg0, %c0_i32 : i32, i32
  }
  func.func @transform_1(%arg0: i32) -> (i32, i32) {
    %c0_i32 = arith.constant 0 : i32
    %c0_i32_0 = arith.constant 0 : i32
    return %arg0, %c0_i32 : i32, i32
  }
}

</mosaic_0001>

<bundles_post_ra>
// kernel: tpu_custom_call.1
= control target key start
LH: loop header
LB: loop body
LE: loop exit
PB: predicated region body
PF: predicated region fallthrough
CT: control target
= control target key end

     0   :  { %6 = vsyncpa [#allocation3], 0  ;;  %s144_s0 = inlined_call_operand.hbm [shape: f32[16,256], index: 0, kind: input, shape index: {}, may-alias: {0,1}]   ;;  %s145_s1 = inlined_call_operand.hbm [shape: f32[16,256], index: 1, kind: output, shape index: {}, may-alias: {0,1}]  }
   0x1   :  { %7 = vsyncpa [#allocation4], 0  ;;  %s100_s6 = smov [#allocation2]   ;;  %s52_s10 = scalar_lea.hbm %s144_s0, 512 }
   0x2   :  { %s13_s7 = sshll.u32 %s100_s6, 4  ;;  %p53_p0 = scmp.ne.s32.totalorder %s144_s0, %s52_s10  ;;  %s14_s7 = int_to_ptr.vmem [resolvable:$true] %s13_s7 }
   0x3   :  { %p56_p1 = scmp.lt.u32.totalorder %s52_s10, %s144_s0 }
   0x5   :  { %p58_p2 = pnand %p56_p1, %p53_p0 }
   0x7   :  { %61 = shalt.err (!%p58_p2)
}
   0x8   :  { %s62_s15 = scalar_lea.vmem %s14_s7, 512  ;;  %p67_p4 = scmp.lt.s32.totalorder %s14_s7, %s14_s7 }
   0x9   :  { %p63_p3 = scmp.ne.s32.totalorder %s14_s7, %s62_s15  ;;  %p68_p5 = scmp.lt.s32.totalorder %s62_s15, %s62_s15 }
   0xb   :  { %p69_p6 = por %p68_p5, %p67_p4 }
   0xd   :  { %p70_p7 = pnand %p69_p6, %p63_p3 }
   0xf   :  { %73 = shalt.err (!%p70_p7)
}
  0x10   :  { %s101_s16 = smov 256   ;;  %s102_s17 = smov 16  }
  0x11   :  { %19 = dma.hbm_to_vmem [thread:$0]  %s144_s0, 512, %s14_s7, [#allocation3], %s101_s16, %s101_s16, %s102_s17  }
  0x12   :  { %96 = dma.done.wait [#allocation3], 512  }
  0x13   :  { %97 = vsyncadd [#allocation3], 4294966784  ;;  %s103_s20 = smov [#allocation5]   ;;  %v23_v0 = vld [vmem:[#allocation2] sm:$0xff]  ;;  %v24_v1 = vld [vmem:[#allocation2 + $0x8] sm:$0xff] }
  0x14   :  { %s36_s21 = sshll.u32 %s103_s20, 4  ;;  %v25_v2 = vld [vmem:[#allocation2 + $0x10] sm:$0xff]  ;;  %27 = vst [vmem:[#allocation5] sm:$0xff] %v23_v0  ;;  %28 = vst [vmem:[#allocation5 + $0x8] sm:$0xff] %v24_v1  ;;  %v26_v3 = vld [vmem:[#allocation2 + $0x18] sm:$0xff]  ;;  %s37_s21 = int_to_ptr.vmem [resolvable:$true] %s36_s21 }
  0x15   :  { %29 = vst [vmem:[#allocation5 + $0x10] sm:$0xff] %v25_v2  ;;  %30 = vst [vmem:[#allocation5 + $0x18] sm:$0xff] %v26_v3  ;;  %s74_s22 = scalar_lea.vmem %s37_s21, 512  ;;  %p79_p9 = scmp.lt.s32.totalorder %s37_s21, %s37_s21 }
  0x16   :  { %p75_p8 = scmp.ne.s32.totalorder %s37_s21, %s74_s22  ;;  %p80_p10 = scmp.lt.s32.totalorder %s74_s22, %s74_s22 }
  0x18   :  { %p81_p11 = por %p80_p10, %p79_p9 }
  0x1a   :  { %p82_p12 = pnand %p81_p11, %p75_p8 }
  0x1c   :  { %85 = shalt.err (!%p82_p12)
}
  0x1d   :  { %s86_s24 = scalar_lea.hbm %s145_s1, 512 }
  0x1e   :  { %p87_p13 = scmp.ne.s32.totalorder %s145_s1, %s86_s24  ;;  %p90_p0 = scmp.lt.u32.totalorder %s86_s24, %s145_s1 }
  0x20   :  { %p92_p1 = pnand %p90_p0, %p87_p13 }
  0x22   :  { %95 = shalt.err (!%p92_p1)
}
  0x23   :  { %42 = dma.vmem_to_hbm [thread:$0]  %s37_s21, 512, %s145_s1, [#allocation4], %s101_s16, %s101_s16, %s102_s17  }
  0x24   :  { %98 = dma.done.wait [#allocation4], 512  }
  0x25   :  { %99 = vsyncadd [#allocation4], 4294966784 }
  0x26   :  { %46 = vsyncpa [#allocation3], 1 }
  0x27   :  { %47 = vsyncpa [#allocation4], 1 }

</bundles_post_ra>
